<compile_context>
chip_gen: v5e
topology: v5e:2x2
jax: 0.10.0
libtpu: 0.0.40
codegen_flags: <defaults>
</compile_context>

<pallas_src>
import functools

import jax
import jax.numpy as jnp
from jax import lax
from jax.experimental import pallas as pl
from jax.experimental.pallas import tpu as pltpu


def _gated_masked_conv_kernel(x_ref, wbig_ref, bbig_ref, wh1_ref, bh1_ref,
                              out_ref, *, H, W, C, n):
    f32 = jnp.float32
    x = x_ref[...]                       # (2C, n): rows [:C] = v_stack, [C:] = h_stack
    v = x[:C]
    h = x[C:]

    # Boundary masks over the flattened (b, y, x) lane index.  Grid tiles always start
    # at a batch boundary, so (p mod H*W) recovers the in-image position.
    p = lax.broadcasted_iota(jnp.int32, (1, n), 1)
    q = p % (H * W)
    xpos = q % W
    m_left = (xpos > 0).astype(f32)          # valid positions for a dx = -1 tap
    m_right = (xpos < W - 1).astype(f32)     # valid positions for a dx = +1 tap
    m_top = (q >= W).astype(f32)             # valid positions for a dy = -1 tap (y > 0)

    def tap(arr, shift, mask):
        # out[:, p] = arr[:, p + shift], zeroed where the tap falls outside the image.
        # pltpu.roll wraps around, but every wrapped position (including across batch
        # boundaries inside a tile) is masked, so roll + mask == zero-padded conv tap.
        t = arr if shift == 0 else pltpu.roll(arr, shift=(-shift) % n, axis=1)
        return t if mask is None else t * mask

    # Stacked tap activations (8C, n).  Row-block order MUST match the wrapper's
    # column-block packing of w_big:
    #   [h(kx=0), h(kx=1), v(0,0), v(0,1), v(0,2), v(1,0), v(1,1), v(1,2)]
    taps = jnp.concatenate(
        [tap(h, -1, m_left), h,
         tap(v, -W - 1, m_top * m_left), tap(v, -W, m_top),
         tap(v, -W + 1, m_top * m_right),
         tap(v, -1, m_left), v, tap(v, 1, m_right)],
        axis=0)

    # One fused matmul gives (4C, n): rows [:2C] = vertical-stack features (biased),
    # rows [2C:] = horizontal-stack features (masked conv + folded vert->horiz 1x1).
    feat = jnp.dot(wbig_ref[...], taps, preferred_element_type=f32) + bbig_ref[...]

    v_out = jnp.tanh(feat[:C]) * jax.nn.sigmoid(feat[C:2 * C])
    hgated = jnp.tanh(feat[2 * C:3 * C]) * jax.nn.sigmoid(feat[3 * C:])
    # final 1x1 conv + residual (residual reuses the already-loaded h rows).
    h_out = jnp.dot(wh1_ref[...], hgated, preferred_element_type=f32) + bh1_ref[...] + h

    out_ref[...] = jnp.concatenate([v_out, h_out], axis=0).astype(out_ref.dtype)


def _pick_batch_tile(batch, hw, c2, budget_bytes=2 * 1024 * 1024):
    """Largest batch divisor whose input block stays under budget and whose lane count
    is 128-aligned; otherwise the smallest aligned divisor; otherwise the full batch
    (block == full array is always a legal BlockSpec)."""
    aligned = [d for d in range(1, batch + 1)
               if batch % d == 0 and (d * hw) % 128 == 0]
    if not aligned:
        return batch
    within = [d for d in aligned if d * hw * c2 * 4 <= budget_bytes]
    return max(within) if within else min(aligned)


def gated_masked_conv_pallas(v_nchw, h_nchw, params):
    """GatedMaskedConv forward.  Inputs/outputs are NCHW float32 (PyTorch layout)."""
    B, C, H, W = v_nchw.shape
    C2 = 2 * C
    HW = H * W
    N = B * HW

    # --- pack (v, h) NCHW -> single (2C, B*H*W) slab: channels on sublanes ---------
    x = jnp.concatenate([v_nchw, h_nchw], axis=1)                  # (B, 2C, H, W)
    x = jnp.transpose(x, (1, 0, 2, 3)).reshape(C2, N).astype(jnp.float32)

    # --- weights: apply masks, fold the vert->horiz 1x1, pack into one matrix ------
    wv = params["wv"] * params["mask_v"][None, None]               # (2C, C, 3, 3)
    wh = params["wh"] * params["mask_h"][None, None]               # (2C, C, 1, 3)
    w2h = params["wv2h"][:, :, 0, 0].astype(jnp.float32)           # (2C, 2C)
    wh1 = params["wh1"][:, :, 0, 0].astype(jnp.float32)            # (C, C)

    v_taps = [wv[:, :, ky, kx] for ky in (0, 1) for kx in (0, 1, 2)]   # 6 x (2C, C); ky==2 masked off
    h_taps = [wh[:, :, 0, kx] for kx in (0, 1)]                        # 2 x (2C, C); kx==2 masked off
    zero_blk = jnp.zeros((C2, C), jnp.float32)

    # Row block 0 (vfeat): v taps only.   Row block 1 (hfeat): h taps + W2h @ Wv taps.
    w_v_rows = jnp.concatenate([zero_blk, zero_blk] + v_taps, axis=1)            # (2C, 8C)
    w_h_rows = jnp.concatenate(h_taps + [w2h @ t for t in v_taps], axis=1)       # (2C, 8C)
    w_big = jnp.concatenate([w_v_rows, w_h_rows], axis=0).astype(jnp.float32)    # (4C, 8C)

    bv = params["bv"].astype(jnp.float32)
    b_big = jnp.concatenate(
        [bv, params["bh"].astype(jnp.float32) + w2h @ bv + params["bv2h"].astype(jnp.float32)],
        axis=0).reshape(-1, 1)                                                   # (4C, 1)
    bh1 = params["bh1"].reshape(-1, 1).astype(jnp.float32)                       # (C, 1)

    # --- batch-tile the lane axis (tiles always align to batch boundaries) ---------
    bt = _pick_batch_tile(B, HW, C2)
    n_t = bt * HW
    grid = (N // n_t,)

    data_spec = pl.BlockSpec((C2, n_t), lambda i: (0, i))

    def const_spec(arr):
        zeros = (0,) * arr.ndim
        return pl.BlockSpec(arr.shape, lambda i, zeros=zeros: zeros)

    kernel = functools.partial(_gated_masked_conv_kernel, H=H, W=W, C=C, n=n_t)

    out = pl.pallas_call(
        kernel,
        out_shape=jax.ShapeDtypeStruct((C2, N), jnp.float32),
        grid=grid,
        in_specs=[data_spec,
                  const_spec(w_big), const_spec(b_big),
                  const_spec(wh1), const_spec(bh1)],
        out_specs=data_spec,
        compiler_params=pltpu.CompilerParams(dimension_semantics=("parallel",)),
    )(x, w_big, b_big, wh1, bh1)

    # --- (2C, B*H*W) -> two NCHW tensors to match PyTorch semantics ---------------
    out = jnp.transpose(out.reshape(C2, B, H, W), (1, 0, 2, 3))    # (B, 2C, H, W)
    return out[:, :C], out[:, C:]


def gated_masked_conv_reference(v_nchw, h_nchw, params):
    """Pure-JAX (XLA) reference matching the PyTorch forward, NCHW."""
    dn = lax.conv_dimension_numbers(v_nchw.shape, params["wv"].shape,
                                    ("NCHW", "OIHW", "NCHW"))

    def conv(x, w, b, padding):
        y = lax.conv_general_dilated(x, w, window_strides=(1, 1),
                                     padding=padding, dimension_numbers=dn,
                                     precision=lax.Precision.HIGHEST)
        return y + b[None, :, None, None]

    C = v_nchw.shape[1]
    wv = params["wv"] * params["mask_v"][None, None]
    wh = params["wh"] * params["mask_h"][None, None]

    v_feat = conv(v_nchw, wv, params["bv"], ((1, 1), (1, 1)))
    v_val, v_gate = v_feat[:, :C], v_feat[:, C:]
    v_out = jnp.tanh(v_val) * jax.nn.sigmoid(v_gate)

    h_feat = conv(h_nchw, wh, params["bh"], ((0, 0), (1, 1)))
    h_feat = h_feat + conv(v_feat, params["wv2h"], params["bv2h"], "VALID")
    h_val, h_gate = h_feat[:, :C], h_feat[:, C:]
    h_feat = jnp.tanh(h_val) * jax.nn.sigmoid(h_gate)
    h_out = conv(h_feat, params["wh1"], params["bh1"], "VALID") + h_nchw
    return v_out, h_out


def make_params(key, c_in):
    ks = jax.random.split(key, 8)
    c2 = 2 * c_in
    scale = 0.1
    params = {
        "wv": scale * jax.random.normal(ks[0], (c2, c_in, 3, 3), jnp.float32),
        "bv": scale * jax.random.normal(ks[1], (c2,), jnp.float32),
        "wh": scale * jax.random.normal(ks[2], (c2, c_in, 1, 3), jnp.float32),
        "bh": scale * jax.random.normal(ks[3], (c2,), jnp.float32),
        "wv2h": scale * jax.random.normal(ks[4], (c2, c2, 1, 1), jnp.float32),
        "bv2h": scale * jax.random.normal(ks[5], (c2,), jnp.float32),
        "wh1": scale * jax.random.normal(ks[6], (c_in, c_in, 1, 1), jnp.float32),
        "bh1": scale * jax.random.normal(ks[7], (c_in,), jnp.float32),
    }
    # masks exactly as in the PyTorch module (kernel_size=3, mask_center=False)
    mask_v = jnp.ones((3, 3), jnp.float32).at[2:, :].set(0.0)   # vertical stack
    mask_h = jnp.ones((1, 3), jnp.float32).at[0, 2:].set(0.0)   # horizontal stack
    params["mask_v"] = mask_v
    params["mask_h"] = mask_h
    return params


if __name__ == "__main__":
    key = jax.random.PRNGKey(0)
    k_v, k_h, k_p = jax.random.split(key, 3)

    B, C, H, W = 2, 4, 16, 16
    v_stack = jax.random.normal(k_v, (B, C, H, W), jnp.float32)
    h_stack = jax.random.normal(k_h, (B, C, H, W), jnp.float32)
    params = make_params(k_p, C)

    fwd = jax.jit(gated_masked_conv_pallas)
    v_out, h_out = fwd(v_stack, h_stack, params)
    v_out = jax.block_until_ready(v_out)
    h_out = jax.block_until_ready(h_out)

    v_ref, h_ref = gated_masked_conv_reference(v_stack, h_stack, params)

    assert v_out.shape == (B, C, H, W) and h_out.shape == (B, C, H, W)
    # 1e-4 absorbs f32 reassociation between the fused/folded kernel and the XLA convs.
    assert jnp.allclose(v_out, v_ref, atol=1e-4, rtol=1e-4), "v_stack_out mismatch"
    assert jnp.allclose(h_out, h_ref, atol=1e-4, rtol=1e-4), "h_stack_out mismatch"

    print("KERNEL_OK")
</pallas_src>

<mosaic_0001>
module attributes {stable_mosaic.version = 11 : i64} {
  func.func @_gated_masked_conv_kernel(%arg0: i32, %arg1: memref<8x512xf32, #tpu.memory_space<vmem>>, %arg2: memref<16x32xf32, #tpu.memory_space<vmem>>, %arg3: memref<16x1xf32, #tpu.memory_space<vmem>>, %arg4: memref<4x4xf32, #tpu.memory_space<vmem>>, %arg5: memref<4x1xf32, #tpu.memory_space<vmem>>, %arg6: memref<8x512xf32, #tpu.memory_space<vmem>>) attributes {dimension_semantics = [#tpu.dimension_semantics<parallel>], iteration_bounds = array<i64: 1>, scalar_prefetch = 0 : i64, scratch_operands = 0 : i64, tpu.core_type = #tpu.core_type<tc>, window_params = [{transform_indices = @transform_0, window_bounds = array<i64: 8, 512>}, {pipeline_mode = #tpu.pipeline_mode<synchronous>, transform_indices = @transform_1, window_bounds = array<i64: 16, 32>}, {pipeline_mode = #tpu.pipeline_mode<synchronous>, transform_indices = @transform_2, window_bounds = array<i64: 16, 1>}, {pipeline_mode = #tpu.pipeline_mode<synchronous>, transform_indices = @transform_3, window_bounds = array<i64: 4, 4>}, {pipeline_mode = #tpu.pipeline_mode<synchronous>, transform_indices = @transform_4, window_bounds = array<i64: 4, 1>}, {transform_indices = @transform_5, window_bounds = array<i64: 8, 512>}]} {
    %c0 = arith.constant 0 : index
    %c0_0 = arith.constant 0 : index
    %0 = vector.load %arg1[%c0, %c0_0] : memref<8x512xf32, #tpu.memory_space<vmem>>, vector<8x512xf32>
    %1 = vector.extract_strided_slice %0 {offsets = [0, 0], sizes = [4, 512], strides = [1, 1]} : vector<8x512xf32> to vector<4x512xf32>
    %2 = vector.extract_strided_slice %0 {offsets = [4, 0], sizes = [4, 512], strides = [1, 1]} : vector<8x512xf32> to vector<4x512xf32>
    %3 = tpu.iota {dimensions = array<i32: 1>} : vector<1x512xi32>
    %c256_i32 = arith.constant 256 : i32
    %c0_i32 = arith.constant 0 : i32
    %4 = arith.cmpi eq, %c256_i32, %c0_i32 : i32
    %c1_i32 = arith.constant 1 : i32
    %5 = arith.select %4, %c1_i32, %c256_i32 : i32
    %6 = vector.broadcast %5 : i32 to vector<1x512xi32>
    %7 = arith.remsi %3, %6 : vector<1x512xi32>
    %c0_i32_1 = arith.constant 0 : i32
    %8 = vector.broadcast %c0_i32_1 : i32 to vector<1x512xi32>
    %9 = arith.cmpi ne, %7, %8 : vector<1x512xi32>
    %c0_i32_2 = arith.constant 0 : i32
    %10 = vector.broadcast %c0_i32_2 : i32 to vector<1x512xi32>
    %11 = arith.cmpi slt, %7, %10 : vector<1x512xi32>
    %c0_i32_3 = arith.constant 0 : i32
    %12 = arith.cmpi slt, %5, %c0_i32_3 : i32
    %13 = vector.broadcast %12 : i1 to vector<1x512xi1>
    %14 = vector.broadcast %13 : vector<1x512xi1> to vector<1x512xi1>
    %15 = arith.xori %11, %14 : vector<1x512xi1>
    %16 = arith.andi %15, %9 : vector<1x512xi1>
    %17 = vector.broadcast %5 : i32 to vector<1x512xi32>
    %18 = arith.addi %7, %17 : vector<1x512xi32>
    %19 = arith.select %16, %18, %7 : vector<1x512xi1>, vector<1x512xi32>
    %c16_i32 = arith.constant 16 : i32
    %c0_i32_4 = arith.constant 0 : i32
    %20 = arith.cmpi eq, %c16_i32, %c0_i32_4 : i32
    %c1_i32_5 = arith.constant 1 : i32
    %21 = arith.select %20, %c1_i32_5, %c16_i32 : i32
    %22 = vector.broadcast %21 : i32 to vector<1x512xi32>
    %23 = arith.remsi %19, %22 : vector<1x512xi32>
    %c0_i32_6 = arith.constant 0 : i32
    %24 = vector.broadcast %c0_i32_6 : i32 to vector<1x512xi32>
    %25 = arith.cmpi ne, %23, %24 : vector<1x512xi32>
    %c0_i32_7 = arith.constant 0 : i32
    %26 = vector.broadcast %c0_i32_7 : i32 to vector<1x512xi32>
    %27 = arith.cmpi slt, %23, %26 : vector<1x512xi32>
    %c0_i32_8 = arith.constant 0 : i32
    %28 = arith.cmpi slt, %21, %c0_i32_8 : i32
    %29 = vector.broadcast %28 : i1 to vector<1x512xi1>
    %30 = vector.broadcast %29 : vector<1x512xi1> to vector<1x512xi1>
    %31 = arith.xori %27, %30 : vector<1x512xi1>
    %32 = arith.andi %31, %25 : vector<1x512xi1>
    %33 = vector.broadcast %21 : i32 to vector<1x512xi32>
    %34 = arith.addi %23, %33 : vector<1x512xi32>
    %35 = arith.select %32, %34, %23 : vector<1x512xi1>, vector<1x512xi32>
    %c0_i32_9 = arith.constant 0 : i32
    %36 = vector.broadcast %c0_i32_9 : i32 to vector<1x512xi32>
    %37 = arith.cmpi sgt, %35, %36 : vector<1x512xi32>
    %38 = arith.extui %37 : vector<1x512xi1> to vector<1x512xi32>
    %39 = arith.sitofp %38 : vector<1x512xi32> to vector<1x512xf32>
    %c15_i32 = arith.constant 15 : i32
    %40 = vector.broadcast %c15_i32 : i32 to vector<1x512xi32>
    %41 = arith.cmpi slt, %35, %40 : vector<1x512xi32>
    %42 = arith.extui %41 : vector<1x512xi1> to vector<1x512xi32>
    %43 = arith.sitofp %42 : vector<1x512xi32> to vector<1x512xf32>
    %c16_i32_10 = arith.constant 16 : i32
    %44 = vector.broadcast %c16_i32_10 : i32 to vector<1x512xi32>
    %45 = arith.cmpi sge, %19, %44 : vector<1x512xi32>
    %46 = arith.extui %45 : vector<1x512xi1> to vector<1x512xi32>
    %47 = arith.sitofp %46 : vector<1x512xi32> to vector<1x512xf32>
    %c1_i32_11 = arith.constant 1 : i32
    %48 = tpu.dynamic_rotate %2 by %c1_i32_11 dim 1 : vector<4x512xf32>, i32 -> vector<4x512xf32>
    %49 = vector.broadcast %39 : vector<1x512xf32> to vector<4x512xf32>
    %50 = arith.mulf %48, %49 : vector<4x512xf32>
    %51 = arith.mulf %47, %39 : vector<1x512xf32>
    %c17_i32 = arith.constant 17 : i32
    %52 = tpu.dynamic_rotate %1 by %c17_i32 dim 1 : vector<4x512xf32>, i32 -> vector<4x512xf32>
    %53 = vector.broadcast %51 : vector<1x512xf32> to vector<4x512xf32>
    %54 = arith.mulf %52, %53 : vector<4x512xf32>
    %c16_i32_12 = arith.constant 16 : i32
    %55 = tpu.dynamic_rotate %1 by %c16_i32_12 dim 1 : vector<4x512xf32>, i32 -> vector<4x512xf32>
    %56 = vector.broadcast %47 : vector<1x512xf32> to vector<4x512xf32>
    %57 = arith.mulf %55, %56 : vector<4x512xf32>
    %58 = arith.mulf %47, %43 : vector<1x512xf32>
    %c15_i32_13 = arith.constant 15 : i32
    %59 = tpu.dynamic_rotate %1 by %c15_i32_13 dim 1 : vector<4x512xf32>, i32 -> vector<4x512xf32>
    %60 = vector.broadcast %58 : vector<1x512xf32> to vector<4x512xf32>
    %61 = arith.mulf %59, %60 : vector<4x512xf32>
    %c1_i32_14 = arith.constant 1 : i32
    %62 = tpu.dynamic_rotate %1 by %c1_i32_14 dim 1 : vector<4x512xf32>, i32 -> vector<4x512xf32>
    %63 = vector.broadcast %39 : vector<1x512xf32> to vector<4x512xf32>
    %64 = arith.mulf %62, %63 : vector<4x512xf32>
    %c511_i32 = arith.constant 511 : i32
    %65 = tpu.dynamic_rotate %1 by %c511_i32 dim 1 : vector<4x512xf32>, i32 -> vector<4x512xf32>
    %66 = vector.broadcast %43 : vector<1x512xf32> to vector<4x512xf32>
    %67 = arith.mulf %65, %66 : vector<4x512xf32>
    %68 = tpu.concatenate %50, %2, %54, %57, %61, %64, %1, %67 in 0 : vector<4x512xf32>, vector<4x512xf32>, vector<4x512xf32>, vector<4x512xf32>, vector<4x512xf32>, vector<4x512xf32>, vector<4x512xf32>, vector<4x512xf32> -> vector<32x512xf32>
    %c0_15 = arith.constant 0 : index
    %c0_16 = arith.constant 0 : index
    %69 = vector.load %arg2[%c0_15, %c0_16] : memref<16x32xf32, #tpu.memory_space<vmem>>, vector<16x32xf32>
    %cst = arith.constant dense<0.000000e+00> : vector<16x512xf32>
    %70 = tpu.matmul %69, %68, %cst {dimension_numbers = #tpu.dot_dimension_numbers<[1], [0], [0], [1], [0, 0, 1, 1], [], []>} : vector<16x32xf32>, vector<32x512xf32>, vector<16x512xf32> -> vector<16x512xf32>
    %c0_17 = arith.constant 0 : index
    %c0_18 = arith.constant 0 : index
    %71 = vector.load %arg3[%c0_17, %c0_18] : memref<16x1xf32, #tpu.memory_space<vmem>>, vector<16x1xf32>
    %72 = vector.broadcast %71 : vector<16x1xf32> to vector<16x512xf32>
    %73 = arith.addf %70, %72 : vector<16x512xf32>
    %74 = vector.extract_strided_slice %73 {offsets = [0, 0], sizes = [4, 512], strides = [1, 1]} : vector<16x512xf32> to vector<4x512xf32>
    %75 = math.tanh %74 : vector<4x512xf32>
    %76 = vector.extract_strided_slice %73 {offsets = [4, 0], sizes = [4, 512], strides = [1, 1]} : vector<16x512xf32> to vector<4x512xf32>
    %77 = arith.negf %76 : vector<4x512xf32>
    %78 = math.exp %77 : vector<4x512xf32>
    %cst_19 = arith.constant 1.000000e+00 : f32
    %79 = vector.broadcast %cst_19 : f32 to vector<4x512xf32>
    %80 = arith.addf %79, %78 : vector<4x512xf32>
    %81 = arith.divf %79, %80 : vector<4x512xf32>
    %82 = arith.mulf %75, %81 : vector<4x512xf32>
    %83 = vector.extract_strided_slice %73 {offsets = [8, 0], sizes = [4, 512], strides = [1, 1]} : vector<16x512xf32> to vector<4x512xf32>
    %84 = math.tanh %83 : vector<4x512xf32>
    %85 = vector.extract_strided_slice %73 {offsets = [12, 0], sizes = [4, 512], strides = [1, 1]} : vector<16x512xf32> to vector<4x512xf32>
    %86 = arith.negf %85 : vector<4x512xf32>
    %87 = math.exp %86 : vector<4x512xf32>
    %cst_20 = arith.constant 1.000000e+00 : f32
    %88 = vector.broadcast %cst_20 : f32 to vector<4x512xf32>
    %89 = arith.addf %88, %87 : vector<4x512xf32>
    %90 = arith.divf %88, %89 : vector<4x512xf32>
    %91 = arith.mulf %84, %90 : vector<4x512xf32>
    %c0_21 = arith.constant 0 : index
    %c0_22 = arith.constant 0 : index
    %92 = vector.load %arg4[%c0_21, %c0_22] : memref<4x4xf32, #tpu.memory_space<vmem>>, vector<4x4xf32>
    %cst_23 = arith.constant dense<0.000000e+00> : vector<4x512xf32>
    %93 = tpu.matmul %92, %91, %cst_23 {dimension_numbers = #tpu.dot_dimension_numbers<[1], [0], [0], [1], [0, 0, 1, 1], [], []>} : vector<4x4xf32>, vector<4x512xf32>, vector<4x512xf32> -> vector<4x512xf32>
    %c0_24 = arith.constant 0 : index
    %c0_25 = arith.constant 0 : index
    %94 = vector.load %arg5[%c0_24, %c0_25] : memref<4x1xf32, #tpu.memory_space<vmem>>, vector<4x1xf32>
    %95 = vector.broadcast %94 : vector<4x1xf32> to vector<4x512xf32>
    %96 = arith.addf %93, %95 : vector<4x512xf32>
    %97 = arith.addf %96, %2 : vector<4x512xf32>
    %98 = tpu.concatenate %82, %97 in 0 : vector<4x512xf32>, vector<4x512xf32> -> vector<8x512xf32>
    %c0_26 = arith.constant 0 : index
    %c0_27 = arith.constant 0 : index
    %99 = vector.load %arg6[%c0_26, %c0_27] : memref<8x512xf32, #tpu.memory_space<vmem>>, vector<8x512xf32>
    tpu.vector_store %arg6[%c0_26, %c0_27], %98 {strides = array<i32>} : memref<8x512xf32, #tpu.memory_space<vmem>>, vector<8x512xf32>,
    return
  }
  func.func @transform_0(%arg0: i32) -> (i32, i32) {
    %c0_i32 = arith.constant 0 : i32
    %c0_i32_0 = arith.constant 0 : i32
    return %c0_i32, %arg0 : i32, i32
  }
  func.func @transform_1(%arg0: i32) -> (i32, i32) {
    %c0_i32 = arith.constant 0 : i32
    %c0_i32_0 = arith.constant 0 : i32
    %c0_i32_1 = arith.constant 0 : i32
    return %c0_i32, %c0_i32_0 : i32, i32
  }
  func.func @transform_2(%arg0: i32) -> (i32, i32) {
    %c0_i32 = arith.constant 0 : i32
    %c0_i32_0 = arith.constant 0 : i32
    %c0_i32_1 = arith.constant 0 : i32
    return %c0_i32, %c0_i32_0 : i32, i32
  }
  func.func @transform_3(%arg0: i32) -> (i32, i32) {
    %c0_i32 = arith.constant 0 : i32
    %c0_i32_0 = arith.constant 0 : i32
    %c0_i32_1 = arith.constant 0 : i32
    return %c0_i32, %c0_i32_0 : i32, i32
  }
  func.func @transform_4(%arg0: i32) -> (i32, i32) {
    %c0_i32 = arith.constant 0 : i32
    %c0_i32_0 = arith.constant 0 : i32
    %c0_i32_1 = arith.constant 0 : i32
    return %c0_i32, %c0_i32_0 : i32, i32
  }
  func.func @transform_5(%arg0: i32) -> (i32, i32) {
    %c0_i32 = arith.constant 0 : i32
    %c0_i32_0 = arith.constant 0 : i32
    return %c0_i32, %arg0 : i32, i32
  }
}

</mosaic_0001>

<bundles_post_ra>
// kernel: gated_masked_conv_pallas.1
= control target key start
LH: loop header
LB: loop body
LE: loop exit
PB: predicated region body
PF: predicated region fallthrough
CT: control target
= control target key end

     0   :  { %s863_s24 = smov 127   ;;  %s864_s25 = smov 1   ;;  %v24_v8 = vlaneseq  ;;  %v868_v18 = vmov 0.0   ;;  %vm318_vm2 = vcmask 1043456   ;;  %v869_v60 = vmov 0   ;;  %s1220_s0 = inlined_call_operand.vmem [shape: f32[8,512], index: 0, kind: input, shape index: {}]   ;;  %s1221_s2 = inlined_call_operand.vmem [shape: f32[16,1], index: 2, kind: input, shape index: {}]   ;;  %s1222_s1 = inlined_call_operand.vmem [shape: f32[16,32], index: 1, kind: input, shape index: {}]   ;;  %s1223_s4 = inlined_call_operand.vmem [shape: f32[4,1], index: 4, kind: input, shape index: {}]   ;;  %s1224_s3 = inlined_call_operand.vmem [shape: f32[4,4], index: 3, kind: input, shape index: {}]   ;;  %s1225_s5 = inlined_call_operand.vmem [shape: f32[8,512], index: 5, kind: output, shape index: {}]  }
   0x1   :  { %v903_v0 = vld [vmem:[%s1220_s0 + $0x18] sm:$0xff]  ;;  %v908_v1 = vld [vmem:[%s1220_s0 + $0x10] sm:$0xff]  ;;  %v913_v2 = vld [vmem:[%s1220_s0] sm:$0xff]  ;;  %s865_s28 = smov 15   ;;  %s866_s29 = smov 16   ;;  %813 = vset.pattern.permute.xlu1 %v869_v60  ;;  %812 = vset.pattern.permute.xlu0 %v869_v60  ;;  %vm349_vm11 = vcmask 261120  }
   0x2   :  { %271 = vrot.lane.b32.xlu1 %v903_v0, %s863_s24  ;;  %253 = vrot.lane.b32.xlu2 %v908_v1, %s864_s25  ;;  %v922_v3 = vld [vmem:[%s1220_s0 + $0x8] sm:$0xff]  ;;  %s867_s30 = smov 17   ;;  %v168_v4 = vrot.slane %v903_v0, 4  ;;  %v167_v5 = vrot.slane %v908_v1, 4  ;;  %v165_v7 = vrot.slane %v913_v2, 4  ;;  %v960_v9 = vand.u32 127, %v24_v8 }
   0x3   :  { %265 = vrot.lane.b32.xlu0 %v913_v2, %s863_s24  ;;  %v166_v6 = vrot.slane %v922_v3, 4  ;;  %v337_v57 = vld [vmem:[%s1221_s2] sm:$0xff]  ;;  %814 = vset.pattern.permute.xlu2 %v869_v60 }
   0x4   :  { %v28_v10 = vadd.s32 384, %v960_v9  ;;  %v27_v14 = vadd.s32 256, %v960_v9  ;;  %vm273_vm1 = vcmp.lt.s32.totalorder %v960_v9, 127  ;;  %vm181_vm5 = vcmp.lt.s32.totalorder %v960_v9, 1 }
   0x5   :  { %vm240_vm8 = vcmp.lt.s32.totalorder %v960_v9, 15  ;;  %vm219_vm9 = vcmp.lt.s32.totalorder %v960_v9, 16  ;;  %vm202_vm10 = vcmp.lt.s32.totalorder %v960_v9, 17 }
   0x6   :  { %v54_v12 = vand.u32 255, %v28_v10  ;;  %v47_v16 = vand.u32 255, %v27_v14 }
   0x8   :  { %v102_v13 = vand.u32 15, %v54_v12  ;;  %v95_v21 = vand.u32 15, %v47_v16  ;;  %vm151_vm7 = vcmp.ge.s32.totalorder %v47_v16, 16 }
   0x9   :  { %v780_v41 = vsel %vm151_vm7, 1.0, %v868_v18 }
   0xa   :  { %255 = vrot.lane.b32.xlu2 %v903_v0, %s864_s25  ;;  %251 = vrot.lane.b32.xlu1 %v922_v3, %s864_s25  ;;  %vm140_vm0 = vcmp.lt.s32.totalorder %v102_v13, 15  ;;  %vm139_vm3 = vcmp.lt.s32.totalorder %v95_v21, 15  ;;  %vm128_vm4 = vcmp.gt.s32.totalorder %v102_v13, 0  ;;  %vm127_vm6 = vcmp.gt.s32.totalorder %v95_v21, 0 }
   0xb   :  { %269 = vrot.lane.b32.xlu0 %v908_v1, %s863_s24  ;;  %v778_v19 = vsel %vm140_vm0, 1.0, %v868_v18  ;;  %v777_v28 = vsel %vm139_vm3, 1.0, %v868_v18  ;;  %v774_v37 = vsel %vm128_vm4, 1.0, %v868_v18  ;;  %v773_v39 = vsel %vm127_vm6, 1.0, %v868_v18 }
   0xc   :  { %v230_v44 = vmul.f32 %v780_v41, %v777_v28  ;;  %v192_v59 = vmul.f32 %v780_v41, %v773_v39 }
  0x12   :  { %234 = vrot.lane.b32.xlu2 %v922_v3, %s865_s28  ;;  %215 = vrot.lane.b32.xlu1 %v908_v1, %s866_s29 }
  0x13   :  { %213 = vrot.lane.b32.xlu0 %v922_v3, %s866_s29 }
  0x1a   :  { %196 = vrot.lane.b32.xlu2 %v922_v3, %s867_s30  ;;  %238 = vrot.lane.b32.xlu1 %v903_v0, %s865_s28 }
  0x1b   :  { %236 = vrot.lane.b32.xlu0 %v908_v1, %s865_s28 }
  0x22   :  { %217 = vrot.lane.b32.xlu2 %v903_v0, %s866_s29  ;;  %200 = vrot.lane.b32.xlu1 %v903_v0, %s867_s30 }
  0x23   :  { %198 = vrot.lane.b32.xlu0 %v908_v1, %s867_s30 }
  0x2a   :  { %179 = vrot.lane.b32.xlu2 %v168_v4, %s864_s25  ;;  %177 = vrot.lane.b32.xlu1 %v167_v5, %s864_s25 }
  0x2b   :  { %175 = vrot.lane.b32.xlu0 %v166_v6, %s864_s25 }
  0x32   :  { %211 = vrot.lane.b32.xlu2 %v913_v2, %s866_s29  ;;  %249 = vrot.lane.b32.xlu1 %v913_v2, %s864_s25 }
  0x33   :  { %267 = vrot.lane.b32.xlu0 %v922_v3, %s863_s24 }
  0x3a   :  { %194 = vrot.lane.b32.xlu1 %v913_v2, %s867_s30  ;;  %173 = vrot.lane.b32.xlu2 %v165_v7, %s864_s25 }
  0x3b   :  { %232 = vrot.lane.b32.xlu0 %v913_v2, %s865_s28 }
  0x42   :  { %341 = vperm.xlu1 %813, %v337_v57  }
  0x5c   :  { %v254_v11 = vpop.permute.xlu2 %253 }
  0x64   :  { %v964_v15 = vpop.permute.xlu2 %255 }
  0x65   :  { %v257_v38 = vsel %vm181_vm5, %v254_v11, %v964_v15 }
  0x66   :  { %v264_v42 = vmul.f32 %v774_v37, %v257_v38 }
  0x68   :  { %v301_v50 = vrot.slane %v264_v42, 4 }
  0x6c   :  { %v973_v25 = vpop.permute.xlu2 %234 }
  0x74   :  { %v272_v17 = vpop.permute.xlu1 %271  ;;  %v987_v34 = vpop.permute.xlu2 %196 }
  0x75   :  { %v968_v20 = vpop.permute.xlu0 %265 }
  0x76   :  { %v277_v22 = vsel %vm273_vm1, %v272_v17, %v968_v20 }
  0x77   :  { %v281_v23 = vmul.f32 %v778_v19, %v277_v22 }
  0x79   :  { %v313_v24 = vrot.slane %v281_v23, 4 }
  0x7b   :  { %v334_v26 = vsel %vm318_vm2, %v903_v0, %v313_v24 }
  0x7c   :  { %437 = vmatpush.msra.mxu3 %v334_v26  ;;  %v977_v27 = vpop.permute.xlu1 %251  ;;  %v1005_v47 = vpop.permute.xlu2 %217  ;;  %v33_v26 = vand.u32 255, %v960_v9 }
  0x7d   :  { %v980_v29 = vpop.permute.xlu0 %269  ;;  %v258_v40 = vsel %vm181_vm5, %v977_v27, %v254_v11  ;;  %v26_v11 = vadd.s32 128, %v960_v9 }
  0x7e   :  { %v274_v30 = vsel %vm273_vm1, %v980_v29, %v272_v17  ;;  %v263_v43 = vmul.f32 %v773_v39, %v258_v40  ;;  %v338_v17 = vld [vmem:[%s1221_s2 + $0x8] sm:$0xff]  ;;  %v1050_v40 = vld [vmem:[%s1222_s1] sm:$0xff]  ;;  %vm149_vm14 = vcmp.ge.s32.totalorder %v33_v26, 16 }
  0x7f   :  { %v280_v31 = vmul.f32 %v777_v28, %v274_v30  ;;  %346 = vperm.xlu0 %812, %v338_v17   ;;  %v40_v23 = vand.u32 255, %v26_v11 }
  0x80   :  { %v300_v51 = vrot.slane %v263_v43, 4 }
  0x81   :  { %v312_v32 = vrot.slane %v280_v31, 4  ;;  %v88_v38 = vand.u32 15, %v40_v23 }
  0x83   :  { %v333_v33 = vsel %vm318_vm2, %v908_v1, %v312_v32  ;;  %vm138_vm13 = vcmp.lt.s32.totalorder %v88_v38, 15  ;;  %vm126_vm15 = vcmp.gt.s32.totalorder %v88_v38, 0 }
  0x84   :  { %414 = vmatpush.msra.mxu2 %v333_v33  ;;  %v216_v35 = vpop.permute.xlu1 %215 }
  0x85   :  { %v990_v36 = vpop.permute.xlu0 %213  ;;  %v220_v61 = vsel %vm219_vm9, %v216_v35, %v1005_v47 }
  0x86   :  { %v221_v54 = vsel %vm219_vm9, %v990_v36, %v216_v35  ;;  %v289_v12 = vrot.slane %v220_v61, 4  ;;  %v81_v35 = vand.u32 15, %v33_v26 }
  0x87   :  { %v226_v58 = vmul.f32 %v780_v41, %v221_v54  ;;  %v336_v54 = vld [vmem:[%s1222_s1 + $0x8] sm:$0xff] }
  0x88   :  { %vm137_vm12 = vcmp.lt.s32.totalorder %v81_v35, 15  ;;  %vm125_vm0 = vcmp.gt.s32.totalorder %v81_v35, 0 }
  0x89   :  { %v288_v13 = vrot.slane %v226_v58, 4  ;;  %v775_v43 = vsel %vm137_vm12, 1.0, %v868_v18 }
  0x8c   :  { %v1002_v45 = vpop.permute.xlu1 %238 }
  0x8d   :  { %v237_v46 = vpop.permute.xlu0 %236 }
  0x8e   :  { %v241_v48 = vsel %vm240_vm8, %v237_v46, %v1002_v45  ;;  %v242_v49 = vsel %vm240_vm8, %v973_v25, %v237_v46 }
  0x8f   :  { %v247_v52 = vmul.f32 %v242_v49, %v230_v44  ;;  %v248_v53 = vmul.f32 %v778_v19, %v241_v48  ;;  %v1037_v19 = vpop.permute.xlu2 %179  ;;  %v776_v44 = vsel %vm138_vm13, 1.0, %v868_v18 }
  0x91   :  { %v329_v55 = vsel %vm318_vm2, %v247_v52, %v300_v51  ;;  %v330_v56 = vsel %vm318_vm2, %v248_v53, %v301_v50 }
  0x92   :  { %415 = vmatpush.msra.mxu2 %v329_v55  ;;  %438 = vmatpush.msra.mxu3 %v330_v56  ;;  %v772_v55 = vsel %vm126_vm15, 1.0, %v868_v18 }
  0x94   :  { %v1025_v62 = vpop.permute.xlu1 %200 }
  0x95   :  { %v199_v63 = vpop.permute.xlu0 %198 }
  0x96   :  { %v203_v8 = vsel %vm202_vm10, %v199_v63, %v1025_v62  ;;  %v204_v10 = vsel %vm202_vm10, %v987_v34, %v199_v63 }
  0x97   :  { %v209_v14 = vmul.f32 %v204_v10, %v192_v59  ;;  %v210_v16 = vmul.f32 %v774_v37, %v203_v8 }
  0x99   :  { %v325_v21 = vsel %vm318_vm2, %v209_v14, %v288_v13  ;;  %v326_v22 = vsel %vm318_vm2, %v210_v16, %v289_v12 }
  0x9a   :  { %416 = vmatpush.msra.mxu2 %v325_v21  ;;  %439 = vmatpush.msra.mxu3 %v326_v22 }
  0x9c   :  { %v178_v24 = vpop.permute.xlu1 %177 }
  0x9d   :  { %v182_v28 = vsel %vm181_vm5, %v178_v24, %v1037_v19  ;;  %v176_v30 = vpop.permute.xlu0 %175 }
  0x9e   :  { %v189_v31 = vmul.f32 %v774_v37, %v182_v28  ;;  %v183_v32 = vsel %vm181_vm5, %v176_v30, %v178_v24  ;;  %v212_v37 = vpop.permute.xlu2 %211 }
  0x9f   :  { %v188_v33 = vmul.f32 %v773_v39, %v183_v32 }
  0xa0   :  { %v322_v41 = vsel %vm318_vm2, %v189_v31, %v903_v0 }
  0xa1   :  { %v321_v42 = vsel %vm318_vm2, %v188_v33, %v908_v1  ;;  %440 = vmatpush.msra.mxu3 %v322_v41 }
  0xa2   :  { %417 = vmatpush.msra.mxu2 %v321_v42  ;;  %787 = vmatmul.msk.f32.vlgmr.msra.gmra.mxu3 %vm349_vm11, %v1050_v40 }
  0xa3   :  { %785 = vmatmul.msk.f32.vlgmr.msra.gmra.mxu2 %vm349_vm11, %v1050_v40 }
  0xa4   :  { %v250_v39 = vpop.permute.xlu1 %249 }
  0xa5   :  { %v268_v46 = vpop.permute.xlu0 %267  ;;  %v259_v50 = vsel %vm181_vm5, %v250_v39, %v977_v27  ;;  %v260_v51 = vsel %vm181_vm5, %v964_v15, %v250_v39  ;;  %v771_v27 = vsel %vm125_vm0, 1.0, %v868_v18 }
  0xa6   :  { %v275_v48 = vsel %vm273_vm1, %v268_v46, %v980_v29  ;;  %v276_v49 = vsel %vm273_vm1, %v968_v20, %v268_v46  ;;  %v779_v29 = vsel %vm149_vm14, 1.0, %v868_v18  ;;  %v223_v20 = vsel %vm219_vm9, %v1005_v47, %v212_v37  ;;  %v174_v58 = vpop.permute.xlu2 %173 }
  0xa7   :  { %v278_v52 = vmul.f32 %v775_v43, %v276_v49  ;;  %v279_v53 = vmul.f32 %v776_v44, %v275_v48  ;;  %v261_v15 = vmul.f32 %v771_v27, %v260_v51  ;;  %v262_v59 = vmul.f32 %v772_v55, %v259_v50 }
  0xa8   :  { %v190_v63 = vmul.f32 %v779_v29, %v771_v27  ;;  %v228_v8 = vmul.f32 %v779_v29, %v775_v43  ;;  %v222_v18 = vsel %vm219_vm9, %v212_v37, %v990_v36  ;;  %v224_v47 = vmul.f32 %v779_v29, %v223_v20 }
  0xa9   :  { %v310_v56 = vrot.slane %v278_v52, 4  ;;  %v311_v57 = vrot.slane %v279_v53, 4  ;;  %v184_v11 = vsel %vm181_vm5, %v174_v58, %v176_v30  ;;  %v185_v12 = vsel %vm181_vm5, %v1037_v19, %v174_v58 }
  0xaa   :  { %788 = vmatmul.msk.f32.gmra.mxu3 %vm349_vm11, %v336_v54  ;;  %v298_v16 = vrot.slane %v261_v15, 4  ;;  %v299_v17 = vrot.slane %v262_v59, 4  ;;  %v287_v28 = vrot.slane %v222_v18, 4  ;;  %v186_v30 = vmul.f32 %v771_v27, %v185_v12  ;;  %v641_v15 = vld [vmem:[%s1223_s4] sm:$0xf] }
  0xab   :  { %786 = vmatmul.msk.f32.gmra.mxu2 %vm349_vm11, %v336_v54  ;;  %v331_v60 = vsel %vm318_vm2, %v913_v2, %v310_v56  ;;  %v332_v61 = vsel %vm318_vm2, %v922_v3, %v311_v57  ;;  %v187_v31 = vmul.f32 %v772_v55, %v184_v11  ;;  %644 = vperm.xlu2 %814, %v641_v15  }
  0xac   :  { %368 = vmatpush.msra.mxu0 %v331_v60  ;;  %391 = vmatpush.msra.mxu1 %v332_v61  ;;  %v195_v10 = vpop.permute.xlu1 %194  ;;  %v319_v9 = vsel %vm318_vm2, %v186_v30, %v913_v2 }
  0xad   :  { %v205_v13 = vsel %vm202_vm10, %v195_v10, %v987_v34  ;;  %v206_v14 = vsel %vm202_vm10, %v1025_v62, %v195_v10  ;;  %v233_v36 = vpop.permute.xlu0 %232  ;;  %v286_v34 = vrot.slane %v224_v47, 4  ;;  %vm647_vm10 = vcmask 31744  }
  0xae   :  { %v243_v21 = vsel %vm240_vm8, %v233_v36, %v973_v25  ;;  %v244_v22 = vsel %vm240_vm8, %v1002_v45, %v233_v36  ;;  %v207_v19 = vmul.f32 %v206_v14, %v190_v63  ;;  %v208_v23 = vmul.f32 %v772_v55, %v205_v13 }
  0xaf   :  { %v245_v24 = vmul.f32 %v244_v22, %v228_v8  ;;  %v246_v26 = vmul.f32 %v776_v44, %v243_v21  ;;  %v320_v45 = vsel %vm318_vm2, %v187_v31, %v922_v3 }
  0xb0   :  { %v323_v25 = vsel %vm318_vm2, %v207_v19, %v286_v34  ;;  %v324_v33 = vsel %vm318_vm2, %v208_v23, %v287_v28 }
  0xb1   :  { %v327_v62 = vsel %vm318_vm2, %v245_v24, %v298_v16  ;;  %v328_v32 = vsel %vm318_vm2, %v246_v26, %v299_v17 }
  0xb2   :  { %369 = vmatpush.msra.mxu0 %v327_v62  ;;  %392 = vmatpush.msra.mxu1 %v328_v32  ;;  %v640_v32 = vld [vmem:[%s1224_s3] sm:$0xf] }
  0xb4   :  { %370 = vmatpush.msra.mxu0 %v323_v25  ;;  %393 = vmatpush.msra.mxu1 %v324_v33 }
  0xb6   :  { %371 = vmatpush.msra.mxu0 %v319_v9  ;;  %394 = vmatpush.msra.mxu1 %v320_v45 }
  0xb7   :  { %781 = vmatmul.msk.f32.vlgmr.msra.gmra.mxu0 %vm349_vm11, %v1050_v40  ;;  %783 = vmatmul.msk.f32.vlgmr.msra.gmra.mxu1 %vm349_vm11, %v1050_v40 }
  0xbf   :  { %782 = vmatmul.msk.f32.gmra.mxu0 %vm349_vm11, %v336_v54  ;;  %784 = vmatmul.msk.f32.gmra.mxu1 %vm349_vm11, %v336_v54 }
  0xf1   :  { %v347_v41 = vpop.permute.xlu0 %346 }
 0x125   :  { %v1123_v35 = vpop.f32.mrf.mxu3 }
 0x126   :  { %v1125_v38 = vpop.f32.mrf.mxu2 }
 0x12d   :  { %v445_v42 = vpop.f32.mrf.mxu3 }
 0x12e   :  { %v422_v37 = vpop.f32.mrf.mxu2  ;;  %v446_v39 = vadd.f32 %v445_v42, %v347_v41 }
 0x12f   :  { %v423_v43 = vadd.f32 %v422_v37, %v347_v41 }
 0x130   :  { %v796_v44 = vmul.f32 -1.442695, %v446_v39 }
 0x131   :  { %v795_v46 = vmul.f32 -1.442695, %v423_v43 }
 0x132   :  { %815 = vpow2.f32 %v796_v44 }
 0x133   :  { %817 = vpow2.f32 %v795_v46 }
 0x134   :  { %v1127_v48 = vpop.f32.mrf.mxu0  ;;  %v1129_v49 = vpop.f32.mrf.mxu1 }
 0x138   :  { %v816_v40 = vpop.eup %815 }
 0x139   :  { %v818_v50 = vpop.eup %817  ;;  %v563_v51 = vadd.f32 1.0, %v816_v40 }
 0x13a   :  { %v562_v52 = vadd.f32 1.0, %v818_v50 }
 0x13b   :  { %vm614_vm4 = vweird.f32 %v563_v51  ;;  %v618_v13 = vand.u32 2147483647, %v563_v51  ;;  %v620_v14 = vand.u32 2147483648, %v563_v51 }
 0x13c   :  { %v376_v53 = vpop.f32.mrf.mxu0  ;;  %v399_v54 = vpop.f32.mrf.mxu1  ;;  %819 = vrcp.f32 %v562_v52  ;;  %vm599_vm1 = vweird.f32 %v562_v52  ;;  %v605_v8 = vand.u32 2147483648, %v562_v52  ;;  %v603_v47 = vand.u32 2147483647, %v562_v52 }
 0x13d   :  { %v1131_v29 = vadd.f32 %v376_v53, %v347_v41  ;;  %v1133_v55 = vadd.f32 %v399_v54, %v347_v41  ;;  %821 = vrcp.f32 %v563_v51  ;;  %v621_v26 = vor.u32 1.1754944e-38, %v620_v14 }
 0x13e   :  { %v606_v16 = vor.u32 1.1754944e-38, %v605_v8  ;;  %vm604_vm7 = vcmp.eq.f32.partialorder %v603_v47, 8.507059e+37  ;;  %vm619_vm9 = vcmp.eq.f32.partialorder %v618_v13, 8.507059e+37 }
 0x13f   :  { %v793_v20 = vmul.f32 -1.442695, %v1131_v29  ;;  %v794_v27 = vmul.f32 -1.442695, %v1133_v55 }
 0x141   :  { %823 = vpow2.f32 %v793_v20 }
 0x142   :  { %v820_v56 = vpop.eup %819  ;;  %825 = vpow2.f32 %v794_v27 }
 0x143   :  { %v822_v57 = vpop.eup %821  ;;  %v595_v58 = vmul.f32 %v820_v56, %v562_v52  ;;  %vm600_vm3 = vweird.f32 %v820_v56 }
 0x144   :  { %v610_v63 = vmul.f32 %v822_v57, %v563_v51  ;;  %vm601_vm5 = vmor %vm599_vm1, %vm600_vm3  ;;  %vm615_vm6 = vweird.f32 %v822_v57 }
 0x145   :  { %v596_v61 = vsub.f32 1.0, %v595_v58  ;;  %vm616_vm8 = vmor %vm614_vm4, %vm615_vm6 }
 0x146   :  { %v611_v10 = vsub.f32 1.0, %v610_v63 }
 0x147   :  { %v824_v59 = vpop.eup %823  ;;  %v597_v18 = vmul.f32 %v820_v56, %v596_v61 }
 0x148   :  { %v560_v60 = vadd.f32 1.0, %v824_v59  ;;  %v826_v11 = vpop.eup %825  ;;  %v612_v17 = vmul.f32 %v822_v57, %v611_v10 }
 0x149   :  { %v598_v12 = vadd.f32 %v820_v56, %v597_v18  ;;  %v561_v36 = vadd.f32 1.0, %v826_v11 }
 0x14a   :  { %827 = vrcp.f32 %v560_v60  ;;  %v613_v19 = vadd.f32 %v822_v57, %v612_v17  ;;  %v575_v45 = vand.u32 2147483648, %v560_v60  ;;  %vm569_vm12 = vweird.f32 %v560_v60 }
 0x14b   :  { %829 = vtanh.f32 %v423_v43  ;;  %v602_v21 = vsel %vm601_vm5, %v820_v56, %v598_v12  ;;  %v590_v51 = vand.u32 2147483648, %v561_v36  ;;  %v588_v54 = vand.u32 2147483647, %v561_v36 }
 0x14c   :  { %831 = vtanh.f32 %v446_v39  ;;  %v607_v22 = vsel %vm604_vm7, %v606_v16, %v602_v21  ;;  %v617_v30 = vsel %vm616_vm8, %v822_v57, %v613_v19  ;;  %v573_v39 = vand.u32 2147483647, %v560_v60 }
 0x14d   :  { %833 = vrcp.f32 %v561_v36  ;;  %v630_v24 = vrot.slane %v607_v22, 4  ;;  %v622_v62 = vsel %vm619_vm9, %v621_v26, %v617_v30  ;;  %v576_v46 = vor.u32 1.1754944e-38, %v575_v45 }
 0x14e   :  { %v631_v25 = vrot.slane %v622_v62, 4  ;;  %835 = vtanh.f32 %v1131_v29  ;;  %vm574_vm14 = vcmp.eq.f32.partialorder %v573_v39, 8.507059e+37  ;;  %vm584_vm0 = vweird.f32 %v561_v36 }
 0x14f   :  { %837 = vtanh.f32 %v1133_v55  ;;  %v591_v57 = vor.u32 1.1754944e-38, %v590_v51  ;;  %vm589_vm3 = vcmp.eq.f32.partialorder %v588_v54, 8.507059e+37  ;;  %v342_v55 = vpop.permute.xlu1 %341 }
 0x150   :  { %v828_v23 = vpop.eup %827  ;;  %v420_v63 = vadd.f32 %v1125_v38, %v342_v55  ;;  %v1156_v8 = vadd.f32 %v1123_v35, %v342_v55  ;;  %v1159_v47 = vadd.f32 %v1127_v48, %v342_v55  ;;  %v1164_v12 = vadd.f32 %v1129_v49, %v342_v55 }
 0x151   :  { %v830_v34 = vpop.eup %829  ;;  %v565_v28 = vmul.f32 %v828_v23, %v560_v60  ;;  %vm570_vm11 = vweird.f32 %v828_v23 }
 0x152   :  { %v638_v31 = vmul.f32 %v830_v34, %v630_v24  ;;  %v832_v9 = vpop.eup %831  ;;  %vm571_vm13 = vmor %vm569_vm12, %vm570_vm11  ;;  %v791_v18 = vmul.f32 -1.442695, %v420_v63  ;;  %v792_v10 = vmul.f32 -1.442695, %v1156_v8  ;;  %v789_v11 = vmul.f32 -1.442695, %v1159_v47 }
 0x153   :  { %v566_v33 = vsub.f32 1.0, %v565_v28  ;;  %v834_v41 = vpop.eup %833  ;;  %v639_v42 = vmul.f32 %v832_v9, %v631_v25  ;;  %v790_v38 = vmul.f32 -1.442695, %v1164_v12 }
 0x154   :  { %801 = vmatpush.msk.msrb.mxu2 %vm318_vm2, %v638_v31  ;;  %v580_v43 = vmul.f32 %v834_v41, %v561_v36  ;;  %vm585_vm15 = vweird.f32 %v834_v41  ;;  %v836_v20 = vpop.eup %835  ;;  %839 = vpow2.f32 %v791_v18 }
 0x155   :  { %802 = vmatmul.msk.f32.vlgmr.msrb.gmra.mxu2 %vm647_vm10, %v640_v32  ;;  %v567_v37 = vmul.f32 %v828_v23, %v566_v33  ;;  %803 = vmatpush.msk.msrb.mxu3 %vm318_vm2, %v639_v42  ;;  %vm586_vm1 = vmor %vm584_vm0, %vm585_vm15  ;;  %v838_v60 = vpop.eup %837  ;;  %841 = vpow2.f32 %v792_v10 }
 0x156   :  { %804 = vmatmul.msk.f32.vlgmr.msrb.gmra.mxu3 %vm647_vm10, %v640_v32  ;;  %v581_v40 = vsub.f32 1.0, %v580_v43  ;;  %843 = vpow2.f32 %v789_v11 }
 0x157   :  { %v568_v44 = vadd.f32 %v828_v23, %v567_v37  ;;  %845 = vpow2.f32 %v790_v38 }
 0x158   :  { %v582_v53 = vmul.f32 %v834_v41, %v581_v40 }
 0x159   :  { %v572_v50 = vsel %vm571_vm13, %v828_v23, %v568_v44 }
 0x15a   :  { %v577_v52 = vsel %vm574_vm14, %v576_v46, %v572_v50  ;;  %v583_v27 = vadd.f32 %v834_v41, %v582_v53  ;;  %v840_v13 = vpop.eup %839 }
 0x15b   :  { %v628_v29 = vrot.slane %v577_v52, 4  ;;  %v842_v14 = vpop.eup %841  ;;  %v466_v35 = vadd.f32 1.0, %v840_v13 }
 0x15c   :  { %v587_v58 = vsel %vm586_vm1, %v834_v41, %v583_v27  ;;  %v844_v36 = vpop.eup %843  ;;  %v467_v16 = vadd.f32 1.0, %v842_v14  ;;  %v645_v27 = vpop.permute.xlu2 %644 }
 0x15d   :  { %v636_v56 = vmul.f32 %v836_v20, %v628_v29  ;;  %v592_v15 = vsel %vm589_vm3, %v591_v57, %v587_v58  ;;  %847 = vrcp.f32 %v466_v35  ;;  %v464_v48 = vadd.f32 1.0, %v844_v36  ;;  %v846_v17 = vpop.eup %845 }
 0x15e   :  { %v629_v59 = vrot.slane %v592_v15, 4  ;;  %849 = vrcp.f32 %v467_v16  ;;  %v1167_v22 = vadd.f32 1.0, %v846_v17  ;;  %vm503_vm4 = vweird.f32 %v466_v35 }
 0x15f   :  { %797 = vmatpush.msk.msrb.mxu0 %vm318_vm2, %v636_v56  ;;  %851 = vrcp.f32 %v464_v48  ;;  %v509_v9 = vand.u32 2147483648, %v466_v35  ;;  %v507_v45 = vand.u32 2147483647, %v466_v35  ;;  %vm518_vm7 = vweird.f32 %v467_v16 }
 0x160   :  { %798 = vmatmul.msk.f32.vlgmr.msrb.gmra.mxu0 %vm647_vm10, %v640_v32  ;;  %v637_v61 = vmul.f32 %v838_v60, %v629_v59  ;;  %853 = vrcp.f32 %v1167_v22  ;;  %v524_v43 = vand.u32 2147483648, %v467_v16  ;;  %v522_v46 = vand.u32 2147483647, %v467_v16 }
 0x161   :  { %v510_v44 = vor.u32 1.1754944e-38, %v509_v9  ;;  %vm508_vm9 = vcmp.eq.f32.partialorder %v507_v45, 8.507059e+37  ;;  %v479_v53 = vand.u32 2147483648, %v464_v48  ;;  %855 = vtanh.f32 %v420_v63 }
 0x162   :  { %799 = vmatpush.msk.msrb.mxu1 %vm318_vm2, %v637_v61  ;;  %v525_v29 = vor.u32 1.1754944e-38, %v524_v43  ;;  %vm473_vm12 = vweird.f32 %v464_v48  ;;  %v477_v20 = vand.u32 2147483647, %v464_v48  ;;  %vm523_vm13 = vcmp.eq.f32.partialorder %v522_v46, 8.507059e+37 }
 0x163   :  { %800 = vmatmul.msk.f32.vlgmr.msrb.gmra.mxu1 %vm647_vm10, %v640_v32  ;;  %v848_v21 = vpop.eup %847  ;;  %857 = vtanh.f32 %v1156_v8  ;;  %v480_v59 = vor.u32 1.1754944e-38, %v479_v53  ;;  %v494_v55 = vand.u32 2147483648, %v1167_v22  ;;  %vm488_vm1 = vweird.f32 %v1167_v22 }
 0x164   :  { %v850_v19 = vpop.eup %849  ;;  %v499_v49 = vmul.f32 %v848_v21, %v466_v35  ;;  %vm504_vm5 = vweird.f32 %v848_v21  ;;  %859 = vtanh.f32 %v1159_v47  ;;  %vm478_vm0 = vcmp.eq.f32.partialorder %v477_v20, 8.507059e+37 }
 0x165   :  { %v852_v23 = vpop.eup %851  ;;  %v514_v24 = vmul.f32 %v850_v19, %v467_v16  ;;  %vm505_vm6 = vmor %vm503_vm4, %vm504_vm5  ;;  %vm519_vm8 = vweird.f32 %v850_v19  ;;  %v492_v18 = vand.u32 2147483647, %v1167_v22  ;;  %861 = vtanh.f32 %v1164_v12 }
 0x166   :  { %v500_v26 = vsub.f32 1.0, %v499_v49  ;;  %v469_v34 = vmul.f32 %v852_v23, %v464_v48  ;;  %v1170_v30 = vpop.eup %853  ;;  %vm1174_vm10 = vmor %vm518_vm7, %vm519_vm8  ;;  %vm474_vm11 = vweird.f32 %v852_v23 }
 0x167   :  { %v515_v28 = vsub.f32 1.0, %v514_v24  ;;  %v484_v25 = vmul.f32 %v1170_v30, %v1167_v22  ;;  %vm475_vm14 = vmor %vm473_vm12, %vm474_vm11  ;;  %vm489_vm15 = vweird.f32 %v1170_v30  ;;  %v856_v11 = vpop.eup %855  ;;  %vm493_vm4 = vcmp.eq.f32.partialorder %v492_v18, 8.507059e+37 }
 0x168   :  { %v501_v31 = vmul.f32 %v848_v21, %v500_v26  ;;  %v470_v62 = vsub.f32 1.0, %v469_v34  ;;  %vm1190_vm3 = vmor %vm488_vm1, %vm489_vm15 }
 0x169   :  { %v516_v32 = vmul.f32 %v850_v19, %v515_v28  ;;  %v485_v37 = vsub.f32 1.0, %v484_v25  ;;  %v858_v48 = vpop.eup %857 }
 0x16a   :  { %v502_v33 = vadd.f32 %v848_v21, %v501_v31  ;;  %v471_v41 = vmul.f32 %v852_v23, %v470_v62 }
 0x16b   :  { %v517_v42 = vadd.f32 %v850_v19, %v516_v32  ;;  %v486_v54 = vmul.f32 %v1170_v30, %v485_v37 }
 0x16c   :  { %v506_v39 = vsel %vm505_vm6, %v848_v21, %v502_v33  ;;  %v472_v50 = vadd.f32 %v852_v23, %v471_v41  ;;  %v495_v21 = vor.u32 1.1754944e-38, %v494_v55 }
 0x16d   :  { %v511_v51 = vsel %vm508_vm9, %v510_v44, %v506_v39  ;;  %v521_v52 = vsel %vm1174_vm10, %v850_v19, %v517_v42  ;;  %v487_v60 = vadd.f32 %v1170_v30, %v486_v54  ;;  %v860_v19 = vpop.eup %859 }
 0x16e   :  { %v534_v56 = vrot.slane %v511_v51, 4  ;;  %v526_v57 = vsel %vm523_vm13, %v525_v29, %v521_v52  ;;  %v476_v58 = vsel %vm475_vm14, %v852_v23, %v472_v50  ;;  %v862_v62 = vpop.eup %861 }
 0x16f   :  { %v481_v63 = vsel %vm478_vm0, %v480_v59, %v476_v58  ;;  %v535_v13 = vrot.slane %v526_v57, 4  ;;  %v491_v35 = vsel %vm1190_vm3, %v1170_v30, %v487_v60 }
 0x170   :  { %v542_v47 = vmul.f32 %v856_v11, %v534_v56  ;;  %v532_v17 = vrot.slane %v481_v63, 4  ;;  %v496_v23 = vsel %vm493_vm4, %v495_v21, %v491_v35 }
 0x171   :  { %v543_v49 = vmul.f32 %v858_v48, %v535_v13  ;;  %v533_v12 = vrot.slane %v496_v23, 4 }
 0x172   :  { %v540_v34 = vmul.f32 %v860_v19, %v532_v17 }
 0x1d8   :  { %v720_v15 = vpop.f32.mrf.mxu2 }
 0x1d9   :  { %v721_v61 = vadd.f32 %v720_v15, %v645_v27  ;;  %v740_v8 = vpop.f32.mrf.mxu3 }
 0x1da   :  { %v741_v14 = vadd.f32 %v740_v8, %v645_v27 }
 0x1db   :  { %v745_v10 = vadd.f32 %v721_v61, %v167_v5 }
 0x1dc   :  { %v746_v1 = vadd.f32 %v741_v14, %v168_v4 }
 0x1dd   :  { %v753_v36 = vrot.slane %v745_v10, 4  ;;  %v680_v16 = vpop.f32.mrf.mxu0 }
 0x1de   :  { %v681_v5 = vadd.f32 %v680_v16, %v645_v27  ;;  %v754_v24 = vrot.slane %v746_v1, 4 }
 0x1df   :  { %v761_v22 = vsel %vm318_vm2, %v542_v47, %v753_v36 }
 0x1e0   :  { %765 = vst [vmem:[%s1225_s5 + $0x10] sm:$0xff] %v761_v22  ;;  %v743_v26 = vadd.f32 %v681_v5, %v165_v7  ;;  %v762_v0 = vsel %vm318_vm2, %v543_v49, %v754_v24  ;;  %v700_v28 = vpop.f32.mrf.mxu1  ;;  %v541_v7 = vmul.f32 %v862_v62, %v533_v12 }
 0x1e1   :  { %766 = vst [vmem:[%s1225_s5 + $0x18] sm:$0xff] %v762_v0  ;;  %v701_v30 = vadd.f32 %v700_v28, %v645_v27 }
 0x1e2   :  { %v751_v4 = vrot.slane %v743_v26, 4 }
 0x1e3   :  { %v744_v2 = vadd.f32 %v701_v30, %v166_v6 }
 0x1e4   :  { %v759_v31 = vsel %vm318_vm2, %v540_v34, %v751_v4 }
 0x1e5   :  { %763 = vst [vmem:[%s1225_s5] sm:$0xff] %v759_v31  ;;  %v752_v32 = vrot.slane %v744_v2, 4 }
 0x1e7   :  { %v760_v25 = vsel %vm318_vm2, %v541_v7, %v752_v32 }
 0x1e8   :  { %764 = vst [vmem:[%s1225_s5 + $0x8] sm:$0xff] %v760_v25 }

</bundles_post_ra>
